<compile_context>
chip_gen: v6e
topology: v6e:2x2x1
jax: 0.10.0
libtpu: 0.0.40
codegen_flags: <defaults>
</compile_context>

<pallas_src>
import jax
import jax.numpy as jnp
from jax.experimental import pallas as pl
from jax.experimental.pallas import tpu as pltpu

D = 6            # state dimension
M = 2            # control dimension
H = 8            # hidden width of the friction MLP
MASS = 1.0
GRAV = 9.8
INERTIA = 1.0
INV_MASS = 1.0 / MASS
INV_INERTIA = 1.0 / INERTIA

# flat parameter layout: w1 (2*8) | b1 (8) | w2 (8*2) | b2 (2)  -> 42 scalars
_W1_OFF = 0
_B1_OFF = 16
_W2_OFF = 24
_B2_OFF = 40
_N_PARAMS = 42

_LANE_TILE = 1024  # 8 sublanes * 128 lanes of f32


def _round_up(x, m):
    return ((x + m - 1) // m) * m


def neural_model_kernel(params_ref, z_ref, dx_ref):
    """Per-block body.

    params_ref: (42,) f32 in SMEM (flattened MLP weights/biases).
    z_ref:      (8, tb, 128) f32 in VMEM  -- feature index on axis 0,
                batch sublane-packed on the last two (tiled) axes.
    dx_ref:     (6, tb, 128) f32 in VMEM.
    """
    # Feature slabs, each (tb, 128): full-vreg occupancy (8 sublanes used).
    vx = z_ref[1]
    vy = z_ref[3]
    phi = z_ref[4]
    ux = z_ref[6]
    uy = z_ref[7]

    # ---- friction MLP: Linear(2,8) -> tanh -> Linear(8,2), as VPU FMA chains.
    # h_j = tanh(vx * w1[0,j] + vy * w1[1,j] + b1[j])
    # friction_k = sum_j h_j * w2[j,k] + b2[k]
    f0 = jnp.zeros_like(vx)
    f1 = jnp.zeros_like(vx)
    for j in range(H):
        h_j = jnp.tanh(
            vx * params_ref[_W1_OFF + j]
            + vy * params_ref[_W1_OFF + H + j]
            + params_ref[_B1_OFF + j]
        )
        f0 = f0 + h_j * params_ref[_W2_OFF + 2 * j]
        f1 = f1 + h_j * params_ref[_W2_OFF + 2 * j + 1]
    friction0 = f0 + params_ref[_B2_OFF + 0]
    friction1 = f1 + params_ref[_B2_OFF + 1]

    # ---- pure-copy rows first (cheap, frees vregs early).
    dx_ref[0] = vx                           # dx[:, 0] = z[:, 1]
    dx_ref[2] = vy                           # dx[:, 2] = z[:, 3]
    dx_ref[4] = vy                           # dx[:, 4] = z[:, 3] (verbatim from module)

    # ---- known acceleration (planar quadrotor), reciprocal-multiply form;
    # sin/cos computed right before their consuming stores.
    s_phi = jnp.sin(phi)
    dx_ref[1] = (-ux) * s_phi * INV_MASS + friction0        # a_x + friction[:, 0]
    c_phi = jnp.cos(phi)
    dx_ref[3] = ux * c_phi * INV_MASS - GRAV + friction1    # a_y + friction[:, 1]
    dx_ref[5] = uy * INV_INERTIA                            # a_phi


def neural_model_forward_fm(z_fm, w1, b1, w2, b2, *, block_n=131072):
    """Performance path with a feature-major layout contract.

    z_fm: (D+M, N) f32 (features on axis 0, batch on axis 1).
    w1: (2,8) = Linear(2,8).weight.T, b1: (8,),
    w2: (8,2) = Linear(8,2).weight.T, b2: (2,).
    Returns dx_fm: (D, N) f32.
    """
    assert block_n % _LANE_TILE == 0
    dm, n = z_fm.shape
    assert dm == D + M

    # Flatten the 42 parameters into one small SMEM-resident array.
    params = jnp.concatenate(
        [w1.reshape(-1), b1.reshape(-1), w2.reshape(-1), b2.reshape(-1)]
    ).astype(jnp.float32)
    assert params.shape == (_N_PARAMS,)

    # Pad the batch axis to a multiple of 1024 (8 sublanes x 128 lanes), then
    # pick tn so large N gets >= ~8 grid steps (pipelining + megacore) while
    # staying under ~15 MiB of double-buffered in+out blocks.
    n_pad = _round_up(max(n, 1), _LANE_TILE)
    tn = min(block_n, _round_up(-(-n_pad // 8), _LANE_TILE))
    n_pad = _round_up(n_pad, tn)

    z_fm = z_fm.astype(jnp.float32)
    if n_pad != n:
        z_fm = jnp.pad(z_fm, ((0, 0), (0, n_pad - n)))  # tail-only pad

    nb = n_pad // 128   # total sublane-packed lane-blocks
    tb = tn // 128      # lane-blocks per grid step (multiple of 8)
    z3 = z_fm.reshape(D + M, nb, 128)  # free reshape (row-major contiguous)

    grid = (n_pad // tn,)
    dx3 = pl.pallas_call(
        neural_model_kernel,
        out_shape=jax.ShapeDtypeStruct((D, nb, 128), jnp.float32),
        grid=grid,
        in_specs=[
            # 42 scalars, untiled, in SMEM -> feed scalar-broadcast FMAs.
            pl.BlockSpec(memory_space=pltpu.MemorySpace.SMEM),
            # z: (8, tb, 128) block per grid step, auto-pipelined HBM<->VMEM.
            pl.BlockSpec((D + M, tb, 128), lambda i: (0, i, 0)),
        ],
        out_specs=pl.BlockSpec((D, tb, 128), lambda i: (0, i, 0)),
        compiler_params=pltpu.CompilerParams(
            dimension_semantics=("parallel",),       # shard blocks across v7x's 2 TCs
            vmem_limit_bytes=32 * 1024 * 1024,
        ),
    )(params, z3)

    dx_fm = dx3.reshape(D, n_pad)
    return dx_fm[:, :n] if n_pad != n else dx_fm


def neural_model_forward(z, w1, b1, w2, b2, *, block_n=131072):
    """Module-verbatim interface: z (N, D+M) -> dx (N, D).

    NOTE: the two transposes here are layout plumbing for API compatibility;
    the performance path is `neural_model_forward_fm` with the (features, N)
    contract (no host-side transposes).
    """
    dx_fm = neural_model_forward_fm(z.T, w1, b1, w2, b2, block_n=block_n)
    return dx_fm.T


def reference_forward(z, w1, b1, w2, b2):
    """Pure-JAX reference mirroring the PyTorch forward."""
    v = jnp.stack([z[:, 1], z[:, 3]], axis=1)
    h = jnp.tanh(v @ w1 + b1)
    friction = h @ w2 + b2
    phi = z[:, 4]
    c_phi, s_phi = jnp.cos(phi), jnp.sin(phi)
    ux, uy = z[:, D], z[:, D + 1]
    a_x = -ux * s_phi / MASS
    a_y = ux * c_phi / MASS - GRAV
    a_phi = uy / INERTIA
    dx = jnp.zeros((z.shape[0], D), jnp.float32)
    dx = dx.at[:, 0].set(z[:, 1])
    dx = dx.at[:, 2].set(z[:, 3])
    dx = dx.at[:, 4].set(z[:, 3])
    dx = dx.at[:, 1].set(a_x)
    dx = dx.at[:, 3].set(a_y)
    dx = dx.at[:, 5].set(a_phi)
    dx = dx.at[:, 1].add(friction[:, 0])
    dx = dx.at[:, 3].add(friction[:, 1])
    return dx


if __name__ == "__main__":
    key = jax.random.PRNGKey(0)
    k_z, k_w1, k_b1, k_w2, k_b2, k_z2 = jax.random.split(key, 6)

    # Deterministic parameter init (shapes from nn.Linear(2,8), nn.Linear(8,2)),
    # stored pre-transposed so math is x @ W + b.
    w1 = jax.random.normal(k_w1, (2, H), dtype=jnp.float32) * 0.5
    b1 = jax.random.normal(k_b1, (H,), dtype=jnp.float32) * 0.1
    w2 = jax.random.normal(k_w2, (H, 2), dtype=jnp.float32) * 0.5
    b2 = jax.random.normal(k_b2, (2,), dtype=jnp.float32) * 0.1

    # Small case matching the module's toy usage (module-verbatim interface).
    N1 = 16
    z1 = jax.random.normal(k_z, (N1, D + M), dtype=jnp.float32)
    dx1 = jax.block_until_ready(neural_model_forward(z1, w1, b1, w2, b2))
    ref1 = reference_forward(z1, w1, b1, w2, b2)
    assert dx1.shape == (N1, D)
    assert jnp.allclose(dx1, ref1, atol=1e-5, rtol=1e-5)

    # Feature-major performance path on the same data.
    dx1_fm = jax.block_until_ready(neural_model_forward_fm(z1.T, w1, b1, w2, b2))
    assert dx1_fm.shape == (D, N1)
    assert jnp.allclose(dx1_fm, ref1.T, atol=1e-5, rtol=1e-5)

    # Multi-block case with a ragged tail: exercises the grid, tail-only pad,
    # and sublane-packed pipelining path (3 grid steps at block_n=1024).
    N2 = 2500
    z2 = jax.random.normal(k_z2, (N2, D + M), dtype=jnp.float32)
    dx2_fm = jax.block_until_ready(
        neural_model_forward_fm(z2.T, w1, b1, w2, b2, block_n=1024)
    )
    ref2 = reference_forward(z2, w1, b1, w2, b2)
    assert dx2_fm.shape == (D, N2)
    assert jnp.allclose(dx2_fm, ref2.T, atol=1e-5, rtol=1e-5)

    print("KERNEL_OK")
</pallas_src>

<mosaic_0001>
module attributes {stable_mosaic.version = 11 : i64} {
  func.func @neural_model_kernel(%arg0: i32, %arg1: memref<42xf32, #tpu.memory_space<smem>>, %arg2: memref<8x8x128xf32, #tpu.memory_space<vmem>>, %arg3: memref<6x8x128xf32, #tpu.memory_space<vmem>>) attributes {dimension_semantics = [#tpu.dimension_semantics<parallel>], iteration_bounds = array<i64: 1>, scalar_prefetch = 0 : i64, scratch_operands = 0 : i64, tpu.core_type = #tpu.core_type<tc>, window_params = [{transform_indices = @transform_0, window_bounds = array<i64: 42>}, {transform_indices = @transform_1, window_bounds = array<i64: 8, 8, 128>}, {transform_indices = @transform_2, window_bounds = array<i64: 6, 8, 128>}]} {
    %c1 = arith.constant 1 : index
    %c0 = arith.constant 0 : index
    %c0_0 = arith.constant 0 : index
    %0 = vector.load %arg2[%c1, %c0, %c0_0] : memref<8x8x128xf32, #tpu.memory_space<vmem>>, vector<1x8x128xf32>
    %1 = vector.shape_cast %0 : vector<1x8x128xf32> to vector<8x128xf32>
    %c3 = arith.constant 3 : index
    %c0_1 = arith.constant 0 : index
    %c0_2 = arith.constant 0 : index
    %2 = vector.load %arg2[%c3, %c0_1, %c0_2] : memref<8x8x128xf32, #tpu.memory_space<vmem>>, vector<1x8x128xf32>
    %3 = vector.shape_cast %2 : vector<1x8x128xf32> to vector<8x128xf32>
    %c4 = arith.constant 4 : index
    %c0_3 = arith.constant 0 : index
    %c0_4 = arith.constant 0 : index
    %4 = vector.load %arg2[%c4, %c0_3, %c0_4] : memref<8x8x128xf32, #tpu.memory_space<vmem>>, vector<1x8x128xf32>
    %5 = vector.shape_cast %4 : vector<1x8x128xf32> to vector<8x128xf32>
    %c6 = arith.constant 6 : index
    %c0_5 = arith.constant 0 : index
    %c0_6 = arith.constant 0 : index
    %6 = vector.load %arg2[%c6, %c0_5, %c0_6] : memref<8x8x128xf32, #tpu.memory_space<vmem>>, vector<1x8x128xf32>
    %7 = vector.shape_cast %6 : vector<1x8x128xf32> to vector<8x128xf32>
    %c7 = arith.constant 7 : index
    %c0_7 = arith.constant 0 : index
    %c0_8 = arith.constant 0 : index
    %8 = vector.load %arg2[%c7, %c0_7, %c0_8] : memref<8x8x128xf32, #tpu.memory_space<vmem>>, vector<1x8x128xf32>
    %9 = vector.shape_cast %8 : vector<1x8x128xf32> to vector<8x128xf32>
    %cst = arith.constant 0.000000e+00 : f32
    %10 = vector.broadcast %cst : f32 to vector<8x128xf32>
    %cst_9 = arith.constant 0.000000e+00 : f32
    %11 = vector.broadcast %cst_9 : f32 to vector<8x128xf32>
    %c0_10 = arith.constant 0 : index
    %12 = memref.load %arg1[%c0_10] : memref<42xf32, #tpu.memory_space<smem>>
    %13 = vector.broadcast %12 : f32 to vector<8x128xf32>
    %14 = arith.mulf %1, %13 : vector<8x128xf32>
    %c8 = arith.constant 8 : index
    %15 = memref.load %arg1[%c8] : memref<42xf32, #tpu.memory_space<smem>>
    %16 = vector.broadcast %15 : f32 to vector<8x128xf32>
    %17 = arith.mulf %3, %16 : vector<8x128xf32>
    %18 = arith.addf %14, %17 : vector<8x128xf32>
    %c16 = arith.constant 16 : index
    %19 = memref.load %arg1[%c16] : memref<42xf32, #tpu.memory_space<smem>>
    %20 = vector.broadcast %19 : f32 to vector<8x128xf32>
    %21 = arith.addf %18, %20 : vector<8x128xf32>
    %22 = math.tanh %21 : vector<8x128xf32>
    %c24 = arith.constant 24 : index
    %23 = memref.load %arg1[%c24] : memref<42xf32, #tpu.memory_space<smem>>
    %24 = vector.broadcast %23 : f32 to vector<8x128xf32>
    %25 = arith.mulf %22, %24 : vector<8x128xf32>
    %26 = arith.addf %10, %25 : vector<8x128xf32>
    %c25 = arith.constant 25 : index
    %27 = memref.load %arg1[%c25] : memref<42xf32, #tpu.memory_space<smem>>
    %28 = vector.broadcast %27 : f32 to vector<8x128xf32>
    %29 = arith.mulf %22, %28 : vector<8x128xf32>
    %30 = arith.addf %11, %29 : vector<8x128xf32>
    %c1_11 = arith.constant 1 : index
    %31 = memref.load %arg1[%c1_11] : memref<42xf32, #tpu.memory_space<smem>>
    %32 = vector.broadcast %31 : f32 to vector<8x128xf32>
    %33 = arith.mulf %1, %32 : vector<8x128xf32>
    %c9 = arith.constant 9 : index
    %34 = memref.load %arg1[%c9] : memref<42xf32, #tpu.memory_space<smem>>
    %35 = vector.broadcast %34 : f32 to vector<8x128xf32>
    %36 = arith.mulf %3, %35 : vector<8x128xf32>
    %37 = arith.addf %33, %36 : vector<8x128xf32>
    %c17 = arith.constant 17 : index
    %38 = memref.load %arg1[%c17] : memref<42xf32, #tpu.memory_space<smem>>
    %39 = vector.broadcast %38 : f32 to vector<8x128xf32>
    %40 = arith.addf %37, %39 : vector<8x128xf32>
    %41 = math.tanh %40 : vector<8x128xf32>
    %c26 = arith.constant 26 : index
    %42 = memref.load %arg1[%c26] : memref<42xf32, #tpu.memory_space<smem>>
    %43 = vector.broadcast %42 : f32 to vector<8x128xf32>
    %44 = arith.mulf %41, %43 : vector<8x128xf32>
    %45 = arith.addf %26, %44 : vector<8x128xf32>
    %c27 = arith.constant 27 : index
    %46 = memref.load %arg1[%c27] : memref<42xf32, #tpu.memory_space<smem>>
    %47 = vector.broadcast %46 : f32 to vector<8x128xf32>
    %48 = arith.mulf %41, %47 : vector<8x128xf32>
    %49 = arith.addf %30, %48 : vector<8x128xf32>
    %c2 = arith.constant 2 : index
    %50 = memref.load %arg1[%c2] : memref<42xf32, #tpu.memory_space<smem>>
    %51 = vector.broadcast %50 : f32 to vector<8x128xf32>
    %52 = arith.mulf %1, %51 : vector<8x128xf32>
    %c10 = arith.constant 10 : index
    %53 = memref.load %arg1[%c10] : memref<42xf32, #tpu.memory_space<smem>>
    %54 = vector.broadcast %53 : f32 to vector<8x128xf32>
    %55 = arith.mulf %3, %54 : vector<8x128xf32>
    %56 = arith.addf %52, %55 : vector<8x128xf32>
    %c18 = arith.constant 18 : index
    %57 = memref.load %arg1[%c18] : memref<42xf32, #tpu.memory_space<smem>>
    %58 = vector.broadcast %57 : f32 to vector<8x128xf32>
    %59 = arith.addf %56, %58 : vector<8x128xf32>
    %60 = math.tanh %59 : vector<8x128xf32>
    %c28 = arith.constant 28 : index
    %61 = memref.load %arg1[%c28] : memref<42xf32, #tpu.memory_space<smem>>
    %62 = vector.broadcast %61 : f32 to vector<8x128xf32>
    %63 = arith.mulf %60, %62 : vector<8x128xf32>
    %64 = arith.addf %45, %63 : vector<8x128xf32>
    %c29 = arith.constant 29 : index
    %65 = memref.load %arg1[%c29] : memref<42xf32, #tpu.memory_space<smem>>
    %66 = vector.broadcast %65 : f32 to vector<8x128xf32>
    %67 = arith.mulf %60, %66 : vector<8x128xf32>
    %68 = arith.addf %49, %67 : vector<8x128xf32>
    %c3_12 = arith.constant 3 : index
    %69 = memref.load %arg1[%c3_12] : memref<42xf32, #tpu.memory_space<smem>>
    %70 = vector.broadcast %69 : f32 to vector<8x128xf32>
    %71 = arith.mulf %1, %70 : vector<8x128xf32>
    %c11 = arith.constant 11 : index
    %72 = memref.load %arg1[%c11] : memref<42xf32, #tpu.memory_space<smem>>
    %73 = vector.broadcast %72 : f32 to vector<8x128xf32>
    %74 = arith.mulf %3, %73 : vector<8x128xf32>
    %75 = arith.addf %71, %74 : vector<8x128xf32>
    %c19 = arith.constant 19 : index
    %76 = memref.load %arg1[%c19] : memref<42xf32, #tpu.memory_space<smem>>
    %77 = vector.broadcast %76 : f32 to vector<8x128xf32>
    %78 = arith.addf %75, %77 : vector<8x128xf32>
    %79 = math.tanh %78 : vector<8x128xf32>
    %c30 = arith.constant 30 : index
    %80 = memref.load %arg1[%c30] : memref<42xf32, #tpu.memory_space<smem>>
    %81 = vector.broadcast %80 : f32 to vector<8x128xf32>
    %82 = arith.mulf %79, %81 : vector<8x128xf32>
    %83 = arith.addf %64, %82 : vector<8x128xf32>
    %c31 = arith.constant 31 : index
    %84 = memref.load %arg1[%c31] : memref<42xf32, #tpu.memory_space<smem>>
    %85 = vector.broadcast %84 : f32 to vector<8x128xf32>
    %86 = arith.mulf %79, %85 : vector<8x128xf32>
    %87 = arith.addf %68, %86 : vector<8x128xf32>
    %c4_13 = arith.constant 4 : index
    %88 = memref.load %arg1[%c4_13] : memref<42xf32, #tpu.memory_space<smem>>
    %89 = vector.broadcast %88 : f32 to vector<8x128xf32>
    %90 = arith.mulf %1, %89 : vector<8x128xf32>
    %c12 = arith.constant 12 : index
    %91 = memref.load %arg1[%c12] : memref<42xf32, #tpu.memory_space<smem>>
    %92 = vector.broadcast %91 : f32 to vector<8x128xf32>
    %93 = arith.mulf %3, %92 : vector<8x128xf32>
    %94 = arith.addf %90, %93 : vector<8x128xf32>
    %c20 = arith.constant 20 : index
    %95 = memref.load %arg1[%c20] : memref<42xf32, #tpu.memory_space<smem>>
    %96 = vector.broadcast %95 : f32 to vector<8x128xf32>
    %97 = arith.addf %94, %96 : vector<8x128xf32>
    %98 = math.tanh %97 : vector<8x128xf32>
    %c32 = arith.constant 32 : index
    %99 = memref.load %arg1[%c32] : memref<42xf32, #tpu.memory_space<smem>>
    %100 = vector.broadcast %99 : f32 to vector<8x128xf32>
    %101 = arith.mulf %98, %100 : vector<8x128xf32>
    %102 = arith.addf %83, %101 : vector<8x128xf32>
    %c33 = arith.constant 33 : index
    %103 = memref.load %arg1[%c33] : memref<42xf32, #tpu.memory_space<smem>>
    %104 = vector.broadcast %103 : f32 to vector<8x128xf32>
    %105 = arith.mulf %98, %104 : vector<8x128xf32>
    %106 = arith.addf %87, %105 : vector<8x128xf32>
    %c5 = arith.constant 5 : index
    %107 = memref.load %arg1[%c5] : memref<42xf32, #tpu.memory_space<smem>>
    %108 = vector.broadcast %107 : f32 to vector<8x128xf32>
    %109 = arith.mulf %1, %108 : vector<8x128xf32>
    %c13 = arith.constant 13 : index
    %110 = memref.load %arg1[%c13] : memref<42xf32, #tpu.memory_space<smem>>
    %111 = vector.broadcast %110 : f32 to vector<8x128xf32>
    %112 = arith.mulf %3, %111 : vector<8x128xf32>
    %113 = arith.addf %109, %112 : vector<8x128xf32>
    %c21 = arith.constant 21 : index
    %114 = memref.load %arg1[%c21] : memref<42xf32, #tpu.memory_space<smem>>
    %115 = vector.broadcast %114 : f32 to vector<8x128xf32>
    %116 = arith.addf %113, %115 : vector<8x128xf32>
    %117 = math.tanh %116 : vector<8x128xf32>
    %c34 = arith.constant 34 : index
    %118 = memref.load %arg1[%c34] : memref<42xf32, #tpu.memory_space<smem>>
    %119 = vector.broadcast %118 : f32 to vector<8x128xf32>
    %120 = arith.mulf %117, %119 : vector<8x128xf32>
    %121 = arith.addf %102, %120 : vector<8x128xf32>
    %c35 = arith.constant 35 : index
    %122 = memref.load %arg1[%c35] : memref<42xf32, #tpu.memory_space<smem>>
    %123 = vector.broadcast %122 : f32 to vector<8x128xf32>
    %124 = arith.mulf %117, %123 : vector<8x128xf32>
    %125 = arith.addf %106, %124 : vector<8x128xf32>
    %c6_14 = arith.constant 6 : index
    %126 = memref.load %arg1[%c6_14] : memref<42xf32, #tpu.memory_space<smem>>
    %127 = vector.broadcast %126 : f32 to vector<8x128xf32>
    %128 = arith.mulf %1, %127 : vector<8x128xf32>
    %c14 = arith.constant 14 : index
    %129 = memref.load %arg1[%c14] : memref<42xf32, #tpu.memory_space<smem>>
    %130 = vector.broadcast %129 : f32 to vector<8x128xf32>
    %131 = arith.mulf %3, %130 : vector<8x128xf32>
    %132 = arith.addf %128, %131 : vector<8x128xf32>
    %c22 = arith.constant 22 : index
    %133 = memref.load %arg1[%c22] : memref<42xf32, #tpu.memory_space<smem>>
    %134 = vector.broadcast %133 : f32 to vector<8x128xf32>
    %135 = arith.addf %132, %134 : vector<8x128xf32>
    %136 = math.tanh %135 : vector<8x128xf32>
    %c36 = arith.constant 36 : index
    %137 = memref.load %arg1[%c36] : memref<42xf32, #tpu.memory_space<smem>>
    %138 = vector.broadcast %137 : f32 to vector<8x128xf32>
    %139 = arith.mulf %136, %138 : vector<8x128xf32>
    %140 = arith.addf %121, %139 : vector<8x128xf32>
    %c37 = arith.constant 37 : index
    %141 = memref.load %arg1[%c37] : memref<42xf32, #tpu.memory_space<smem>>
    %142 = vector.broadcast %141 : f32 to vector<8x128xf32>
    %143 = arith.mulf %136, %142 : vector<8x128xf32>
    %144 = arith.addf %125, %143 : vector<8x128xf32>
    %c7_15 = arith.constant 7 : index
    %145 = memref.load %arg1[%c7_15] : memref<42xf32, #tpu.memory_space<smem>>
    %146 = vector.broadcast %145 : f32 to vector<8x128xf32>
    %147 = arith.mulf %1, %146 : vector<8x128xf32>
    %c15 = arith.constant 15 : index
    %148 = memref.load %arg1[%c15] : memref<42xf32, #tpu.memory_space<smem>>
    %149 = vector.broadcast %148 : f32 to vector<8x128xf32>
    %150 = arith.mulf %3, %149 : vector<8x128xf32>
    %151 = arith.addf %147, %150 : vector<8x128xf32>
    %c23 = arith.constant 23 : index
    %152 = memref.load %arg1[%c23] : memref<42xf32, #tpu.memory_space<smem>>
    %153 = vector.broadcast %152 : f32 to vector<8x128xf32>
    %154 = arith.addf %151, %153 : vector<8x128xf32>
    %155 = math.tanh %154 : vector<8x128xf32>
    %c38 = arith.constant 38 : index
    %156 = memref.load %arg1[%c38] : memref<42xf32, #tpu.memory_space<smem>>
    %157 = vector.broadcast %156 : f32 to vector<8x128xf32>
    %158 = arith.mulf %155, %157 : vector<8x128xf32>
    %159 = arith.addf %140, %158 : vector<8x128xf32>
    %c39 = arith.constant 39 : index
    %160 = memref.load %arg1[%c39] : memref<42xf32, #tpu.memory_space<smem>>
    %161 = vector.broadcast %160 : f32 to vector<8x128xf32>
    %162 = arith.mulf %155, %161 : vector<8x128xf32>
    %163 = arith.addf %144, %162 : vector<8x128xf32>
    %c40 = arith.constant 40 : index
    %164 = memref.load %arg1[%c40] : memref<42xf32, #tpu.memory_space<smem>>
    %165 = vector.broadcast %164 : f32 to vector<8x128xf32>
    %166 = arith.addf %159, %165 : vector<8x128xf32>
    %c41 = arith.constant 41 : index
    %167 = memref.load %arg1[%c41] : memref<42xf32, #tpu.memory_space<smem>>
    %168 = vector.broadcast %167 : f32 to vector<8x128xf32>
    %169 = arith.addf %163, %168 : vector<8x128xf32>
    %c0_16 = arith.constant 0 : index
    %c0_17 = arith.constant 0 : index
    %c0_18 = arith.constant 0 : index
    %170 = vector.load %arg3[%c0_16, %c0_17, %c0_18] : memref<6x8x128xf32, #tpu.memory_space<vmem>>, vector<1x8x128xf32>
    %171 = vector.shape_cast %170 : vector<1x8x128xf32> to vector<8x128xf32>
    %172 = vector.shape_cast %1 : vector<8x128xf32> to vector<1x8x128xf32>
    tpu.vector_store %arg3[%c0_16, %c0_17, %c0_18], %172 {strides = array<i32>} : memref<6x8x128xf32, #tpu.memory_space<vmem>>, vector<1x8x128xf32>,
    %c2_19 = arith.constant 2 : index
    %c0_20 = arith.constant 0 : index
    %c0_21 = arith.constant 0 : index
    %173 = vector.load %arg3[%c2_19, %c0_20, %c0_21] : memref<6x8x128xf32, #tpu.memory_space<vmem>>, vector<1x8x128xf32>
    %174 = vector.shape_cast %173 : vector<1x8x128xf32> to vector<8x128xf32>
    %175 = vector.shape_cast %3 : vector<8x128xf32> to vector<1x8x128xf32>
    tpu.vector_store %arg3[%c2_19, %c0_20, %c0_21], %175 {strides = array<i32>} : memref<6x8x128xf32, #tpu.memory_space<vmem>>, vector<1x8x128xf32>,
    %c4_22 = arith.constant 4 : index
    %c0_23 = arith.constant 0 : index
    %c0_24 = arith.constant 0 : index
    %176 = vector.load %arg3[%c4_22, %c0_23, %c0_24] : memref<6x8x128xf32, #tpu.memory_space<vmem>>, vector<1x8x128xf32>
    %177 = vector.shape_cast %176 : vector<1x8x128xf32> to vector<8x128xf32>
    %178 = vector.shape_cast %3 : vector<8x128xf32> to vector<1x8x128xf32>
    tpu.vector_store %arg3[%c4_22, %c0_23, %c0_24], %178 {strides = array<i32>} : memref<6x8x128xf32, #tpu.memory_space<vmem>>, vector<1x8x128xf32>,
    %179 = math.sin %5 : vector<8x128xf32>
    %cst_25 = arith.constant 0.000000e+00 : f32
    %180 = vector.broadcast %cst_25 : f32 to vector<8x128xf32>
    %181 = arith.subf %180, %7 : vector<8x128xf32>
    %182 = arith.mulf %181, %179 : vector<8x128xf32>
    %cst_26 = arith.constant 1.000000e+00 : f32
    %183 = vector.broadcast %cst_26 : f32 to vector<8x128xf32>
    %184 = arith.mulf %182, %183 : vector<8x128xf32>
    %185 = arith.addf %184, %166 : vector<8x128xf32>
    %c1_27 = arith.constant 1 : index
    %c0_28 = arith.constant 0 : index
    %c0_29 = arith.constant 0 : index
    %186 = vector.load %arg3[%c1_27, %c0_28, %c0_29] : memref<6x8x128xf32, #tpu.memory_space<vmem>>, vector<1x8x128xf32>
    %187 = vector.shape_cast %186 : vector<1x8x128xf32> to vector<8x128xf32>
    %188 = vector.shape_cast %185 : vector<8x128xf32> to vector<1x8x128xf32>
    tpu.vector_store %arg3[%c1_27, %c0_28, %c0_29], %188 {strides = array<i32>} : memref<6x8x128xf32, #tpu.memory_space<vmem>>, vector<1x8x128xf32>,
    %189 = math.cos %5 : vector<8x128xf32>
    %190 = arith.mulf %7, %189 : vector<8x128xf32>
    %cst_30 = arith.constant 1.000000e+00 : f32
    %191 = vector.broadcast %cst_30 : f32 to vector<8x128xf32>
    %192 = arith.mulf %190, %191 : vector<8x128xf32>
    %cst_31 = arith.constant 9.800000e+00 : f32
    %193 = vector.broadcast %cst_31 : f32 to vector<8x128xf32>
    %194 = arith.subf %192, %193 : vector<8x128xf32>
    %195 = arith.addf %194, %169 : vector<8x128xf32>
    %c3_32 = arith.constant 3 : index
    %c0_33 = arith.constant 0 : index
    %c0_34 = arith.constant 0 : index
    %196 = vector.load %arg3[%c3_32, %c0_33, %c0_34] : memref<6x8x128xf32, #tpu.memory_space<vmem>>, vector<1x8x128xf32>
    %197 = vector.shape_cast %196 : vector<1x8x128xf32> to vector<8x128xf32>
    %198 = vector.shape_cast %195 : vector<8x128xf32> to vector<1x8x128xf32>
    tpu.vector_store %arg3[%c3_32, %c0_33, %c0_34], %198 {strides = array<i32>} : memref<6x8x128xf32, #tpu.memory_space<vmem>>, vector<1x8x128xf32>,
    %cst_35 = arith.constant 1.000000e+00 : f32
    %199 = vector.broadcast %cst_35 : f32 to vector<8x128xf32>
    %200 = arith.mulf %9, %199 : vector<8x128xf32>
    %c5_36 = arith.constant 5 : index
    %c0_37 = arith.constant 0 : index
    %c0_38 = arith.constant 0 : index
    %201 = vector.load %arg3[%c5_36, %c0_37, %c0_38] : memref<6x8x128xf32, #tpu.memory_space<vmem>>, vector<1x8x128xf32>
    %202 = vector.shape_cast %201 : vector<1x8x128xf32> to vector<8x128xf32>
    %203 = vector.shape_cast %200 : vector<8x128xf32> to vector<1x8x128xf32>
    tpu.vector_store %arg3[%c5_36, %c0_37, %c0_38], %203 {strides = array<i32>} : memref<6x8x128xf32, #tpu.memory_space<vmem>>, vector<1x8x128xf32>,
    return
  }
  func.func @transform_0(%arg0: i32) -> i32 {
    %c0_i32 = arith.constant 0 : i32
    %c0_i32_0 = arith.constant 0 : i32
    return %c0_i32 : i32
  }
  func.func @transform_1(%arg0: i32) -> (i32, i32, i32) {
    %c0_i32 = arith.constant 0 : i32
    %c0_i32_0 = arith.constant 0 : i32
    %c0_i32_1 = arith.constant 0 : i32
    return %c0_i32, %arg0, %c0_i32_0 : i32, i32, i32
  }
  func.func @transform_2(%arg0: i32) -> (i32, i32, i32) {
    %c0_i32 = arith.constant 0 : i32
    %c0_i32_0 = arith.constant 0 : i32
    %c0_i32_1 = arith.constant 0 : i32
    return %c0_i32, %arg0, %c0_i32_0 : i32, i32, i32
  }
}

</mosaic_0001>

<bundles_post_ra>
// kernel: tpu_custom_call.1
= control target key start
LH: loop header
LB: loop body
LE: loop exit
PB: predicated region body
PF: predicated region fallthrough
CT: control target
= control target key end

     0   :  { %7 = vsyncpa [#allocation5], 0  ;;  %s803_s0 = inlined_call_operand.hbm [shape: f32[42], index: 0, kind: input, shape index: {}]   ;;  %s804_s1 = inlined_call_operand.hbm [shape: f32[8,8,128], index: 1, kind: input, shape index: {}]   ;;  %s805_s2 = inlined_call_operand.hbm [shape: f32[6,8,128], index: 2, kind: output, shape index: {}]  }
   0x1   :  { %8 = vsyncpa [#allocation3], 0 }
   0x2   :  { %9 = vsyncpa [#allocation4], 0  ;;  %s586_s9 = smov [#allocation2]   ;;  %s587_s12 = smov [#allocation6]  }
   0x3   :  { %17 = dma.hbm_to_smem %s803_s0, 16, %s586_s9, [#allocation5]  }
   0x4   :  { %s23_s13 = sshll.u32 %s587_s12, 4  ;;  %s24_s13 = int_to_ptr.vmem [resolvable:$true] %s23_s13 }
   0x5   :  { %s548_s14 = scalar_lea.vmem %s24_s13, 1024  ;;  %p553_p1 = scmp.lt.s32.totalorder %s24_s13, %s24_s13 }
   0x6   :  { %p549_p0 = scmp.ne.s32.totalorder %s24_s13, %s548_s14  ;;  %p554_p2 = scmp.lt.s32.totalorder %s548_s14, %s548_s14 }
   0x8   :  { %p555_p3 = por %p554_p2, %p553_p1 }
   0xa   :  { %p556_p4 = pnand %p555_p3, %p549_p0 }
   0xc   :  { %559 = shalt.err (!%p556_p4)
}
   0xd   :  { %s588_s15 = smov 128   ;;  %s589_s16 = smov 8  }
   0xe   :  { %29 = dma.hbm_to_vmem [thread:$0]  %s804_s1, 1024, %s24_s13, [#allocation3], %s588_s15, %s588_s15, %s589_s16  }
   0xf   :  { %580 = dma.done.wait [#allocation5], 16  }
  0x10   :  { %581 = vsyncadd [#allocation5], 4294967280 }
  0x11   :  { %582 = dma.done.wait [#allocation3], 1024  }
  0x12   :  { %583 = vsyncadd [#allocation3], 4294966272 }
  0x13   :  { %36 = sfence }
  0x14   :  { %v621_v0 = vld [vmem:[#allocation6 + $0x8] sm:$0xff]  ;;  %v623_v1 = vld [vmem:[#allocation6 + $0x18] sm:$0xff]  ;;  %v625_v2 = vld [vmem:[#allocation6 + $0x20] sm:$0xff]  ;;  %s47_s0 = sld [smem:[#allocation2]]  ;;  %v590_v41 = vmov 683565275  }
  0x15   :  { %205 = vst [vmem:[#allocation7] sm:$0xff] %v621_v0  ;;  %207 = vst [vmem:[#allocation7 + $0x10] sm:$0xff] %v623_v1  ;;  %s447_s19 = sld [smem:[#allocation2 + $0x8]]  ;;  %v213_v3 = vand.u32 2139095040, %v625_v2  ;;  %v46_v5 = vld [vmem:[#allocation6 + $0x38] sm:$0xff]  ;;  %vm212_vm7 = vcmp.lt.s32.totalorder %v625_v2, 0  ;;  %vm302_vm15 = vweird.f32 %v625_v2 }
  0x16   :  { %209 = vst [vmem:[#allocation7 + $0x20] sm:$0xff] %v623_v1  ;;  %s448_s1 = sld [smem:[#allocation2 + $0x10]]  ;;  %v210_v6 = vand.u32 2147483647, %v625_v2  ;;  %428 = vst [vmem:[#allocation7 + $0x28] sm:$0xff] %v46_v5 }
  0x17   :  { %s631_s20 = sld [smem:[#allocation2 + $0x18]]  ;;  %v214_v4 = vshrl.u32 %v213_v3, 23  ;;  %v591_v46 = vmov 2475754826   ;;  %v592_v50 = vmov 2131351028  }
  0x18   :  { %s451_s21 = sld [smem:[#allocation2 + $0x1]]  ;;  %v217_v14 = vand.u32 8388607, %v210_v6  ;;  %v593_v52 = vmov 2102212464  }
  0x19   :  { %s452_s22 = sld [smem:[#allocation2 + $0x9]]  ;;  %v488_v8 = vadd.s32 4294967169, %v214_v4  ;;  %v594_v56 = vmov 920167782   ;;  %v595_v61 = vmov 1326507024  }
  0x1a   :  { %v48_v7 = vstv %s47_s0  ;;  %s634_s23 = sld [smem:[#allocation2 + $0x11]]  ;;  %v218_v23 = vor.u32 8388608, %v217_v14  ;;  %vm211_vm8 = vcmp.le.f32.partialorder %v210_v6, 0.7853982 }
  0x1b   :  { %v49_v9 = vmul.f32 %v48_v7, %v621_v0  ;;  %v51_v10 = vstv %s447_s19  ;;  %s637_s24 = sld [smem:[#allocation2 + $0x1a]]  ;;  %v220_v12 = vadd.s32 1, %v488_v8 }
  0x1c   :  { %v52_v11 = vmul.f32 %v51_v10, %v623_v1  ;;  %s456_s25 = sld [smem:[#allocation2 + $0x2]]  ;;  %v55_v13 = vstv %s448_s1  ;;  %v660_v34 = vshll.u32 %v218_v23, 8 }
  0x1d   :  { %s457_s26 = sld [smem:[#allocation2 + $0xa]]  ;;  %vm221_vm0 = vcmp.gt.s32.totalorder %v220_v12, 0  ;;  %v59_v35 = vstv %s631_s20 }
  0x1e   :  { %v53_v15 = vadd.f32 %v52_v11, %v49_v9  ;;  %v67_v16 = vstv %s451_s21  ;;  %s642_s27 = sld [smem:[#allocation2 + $0x12]]  ;;  %v222_v19 = vsel %vm221_vm0, %v220_v12, 0 }
  0x1f   :  { %v68_v17 = vmul.f32 %v67_v16, %v621_v0  ;;  %v70_v18 = vstv %s452_s22  ;;  %s645_s28 = sld [smem:[#allocation2 + $0x1c]]  ;;  %v224_v24 = vand.u32 31, %v222_v19  ;;  %v655_v31 = vshrl.u32 %v222_v19, 5 }
  0x20   :  { %v56_v20 = vadd.f32 %v55_v13, %v53_v15  ;;  %v71_v21 = vmul.f32 %v70_v18, %v623_v1  ;;  %s461_s29 = sld [smem:[#allocation2 + $0x3]]  ;;  %v74_v22 = vstv %s634_s23 }
  0x21   :  { %s462_s30 = sld [smem:[#allocation2 + $0xb]]  ;;  %v225_v33 = vsub.s32 32, %v224_v24  ;;  %v78_v38 = vstv %s637_s24  ;;  %v227_v42 = vshll.u32 %v590_v41, %v224_v24  ;;  %v230_v47 = vshll.u32 %v591_v46, %v224_v24 }
  0x22   :  { %512 = vtanh.f32 %v56_v20  ;;  %v72_v25 = vadd.f32 %v71_v21, %v68_v17  ;;  %v86_v26 = vstv %s456_s25  ;;  %s649_s3 = sld [smem:[#allocation2 + $0x13]]  ;;  %vm242_vm1 = vcmp.lt.s32.totalorder %v655_v31, 1 }
  0x23   :  { %v87_v27 = vmul.f32 %v86_v26, %v621_v0  ;;  %v89_v28 = vstv %s457_s26  ;;  %s653_s4 = sld [smem:[#allocation2 + $0x4]]  ;;  %v228_v49 = vshrl.u32 %v591_v46, %v225_v33  ;;  %v231_v51 = vshrl.u32 %v592_v50, %v225_v33 }
  0x24   :  { %v75_v29 = vadd.f32 %v74_v22, %v72_v25  ;;  %v90_v30 = vmul.f32 %v89_v28, %v623_v1  ;;  %v93_v32 = vstv %s642_s27  ;;  %s658_s5 = sld [smem:[#allocation2 + $0xc]]  ;;  %v236_v53 = vshll.u32 %v593_v52, %v224_v24 }
  0x25   :  { %s663_s6 = sld [smem:[#allocation2 + $0x14]]  ;;  %v97_v44 = vstv %s645_s28  ;;  %v237_v57 = vshrl.u32 %v594_v56, %v225_v33  ;;  %v239_v60 = vshll.u32 %v594_v56, %v224_v24  ;;  %v240_v62 = vshrl.u32 %v595_v61, %v225_v33 }
  0x26   :  { %514 = vtanh.f32 %v75_v29  ;;  %v91_v36 = vadd.f32 %v90_v30, %v87_v27  ;;  %v105_v37 = vstv %s461_s29  ;;  %s669_s7 = sld [smem:[#allocation2 + $0x5]]  ;;  %v233_v4 = vshll.u32 %v592_v50, %v224_v24 }
  0x27   :  { %v106_v39 = vmul.f32 %v105_v37, %v621_v0  ;;  %v108_v40 = vstv %s462_s30  ;;  %s673_s8 = sld [smem:[#allocation2 + $0xd]]  ;;  %v234_v5 = vshrl.u32 %v593_v52, %v225_v33  ;;  %v226_v8 = vshrl.u32 %v590_v41, %v225_v33 }
  0x28   :  { %v94_v43 = vadd.f32 %v93_v32, %v91_v36  ;;  %v109_v45 = vmul.f32 %v108_v40, %v623_v1  ;;  %v112_v48 = vstv %s649_s3  ;;  %s676_s9 = sld [smem:[#allocation2 + $0x15]]  ;;  %v229_v9 = vor.u32 %v228_v49, %v227_v42  ;;  %s596_s3 = smov [#allocation7]  }
  0x29   :  { %v124_v55 = vstv %s653_s4  ;;  %s681_s10 = sld [smem:[#allocation2 + $0x6]]  ;;  %v232_v10 = vor.u32 %v231_v51, %v230_v47  ;;  %v238_v13 = vor.u32 %v237_v57, %v236_v53  ;;  %v241_v17 = vor.u32 %v240_v62, %v239_v60  ;;  %s434_s4 = sshll.u32 %s596_s3, 4  ;;  %s435_s4 = int_to_ptr.vmem [resolvable:$true] %s434_s4 }
  0x2a   :  { %516 = vtanh.f32 %v94_v43  ;;  %v110_v54 = vadd.f32 %v109_v45, %v106_v39  ;;  %v125_v58 = vmul.f32 %v124_v55, %v621_v0  ;;  %v127_v59 = vstv %s658_s5  ;;  %s684_s11 = sld [smem:[#allocation2 + $0xe]]  ;;  %s560_s5 = scalar_lea.vmem %s435_s4, 768 }
  0x2b   :  { %v128_v3 = vmul.f32 %v127_v59, %v623_v1  ;;  %v131_v7 = vstv %s663_s6  ;;  %s687_s12 = sld [smem:[#allocation2 + $0x16]]  ;;  %vm245_vm2 = vcmp.lt.s32.totalorder %v655_v31, 4  ;;  %v235_v20 = vor.u32 %v234_v5, %v233_v4  ;;  %p561_p5 = scmp.ne.s32.totalorder %s435_s4, %s560_s5 }
  0x2c   :  { %v113_v63 = vadd.f32 %v112_v48, %v110_v54  ;;  %v143_v12 = vstv %s669_s7  ;;  %s691_s13 = sld [smem:[#allocation2 + $0x1e]]  ;;  %vm243_vm3 = vcmp.lt.s32.totalorder %v655_v31, 2  ;;  %vm244_vm4 = vcmp.lt.s32.totalorder %v655_v31, 3  ;;  %p565_p6 = scmp.lt.s32.totalorder %s435_s4, %s435_s4 }
  0x2d   :  { %v129_v11 = vadd.f32 %v128_v3, %v125_v58  ;;  %v144_v15 = vmul.f32 %v143_v12, %v621_v0  ;;  %v146_v16 = vstv %s673_s8  ;;  %s697_s14 = sld [smem:[#allocation2 + $0x7]]  ;;  %v246_v23 = vsel %vm242_vm1, %v226_v8, %v229_v9  ;;  %p566_p7 = scmp.lt.s32.totalorder %s560_s5, %s560_s5 }
  0x2e   :  { %518 = vtanh.f32 %v113_v63  ;;  %v147_v19 = vmul.f32 %v146_v16, %v623_v1  ;;  %v150_v22 = vstv %s676_s9  ;;  %s702_s17 = sld [smem:[#allocation2 + $0xf]]  ;;  %v251_v26 = vsel %vm245_vm2, %v238_v13, 920167782 }
  0x2f   :  { %v689_v14 = vpop.eup %512  ;;  %v132_v18 = vadd.f32 %v131_v7, %v129_v11  ;;  %v162_v25 = vstv %s681_s10  ;;  %s708_s18 = sld [smem:[#allocation2 + $0x17]]  ;;  %v247_v30 = vsel %vm245_vm2, %v235_v20, 2102212464  ;;  %v255_v32 = vsel %vm245_vm2, %v241_v17, 1326507024  ;;  %p567_p8 = por %p566_p7, %p565_p6 }
  0x30   :  { %v60_v21 = vmul.f32 %v689_v14, %v59_v35  ;;  %v148_v24 = vadd.f32 %v147_v19, %v144_v15  ;;  %s712_s0 = sld [smem:[#allocation2 + $0x20]]  ;;  %v163_v28 = vmul.f32 %v162_v25, %v621_v0  ;;  %v165_v29 = vstv %s684_s11 }
  0x31   :  { %520 = vtanh.f32 %v132_v18  ;;  %s722_s19 = sld [smem:[#allocation2 + $0x22]]  ;;  %v166_v36 = vmul.f32 %v165_v29, %v623_v1  ;;  %v254_v37 = vsel %vm242_vm1, %v232_v10, %v235_v20  ;;  %v169_v39 = vstv %s687_s12  ;;  %p568_p9 = pnand %p567_p8, %p561_p5 }
  0x32   :  { %v151_v35 = vadd.f32 %v150_v22, %v148_v24  ;;  %v250_v40 = vsel %vm242_vm1, %v229_v9, %v232_v10  ;;  %v252_v41 = vsel %vm244_vm4, %v235_v20, %v251_v26  ;;  %s734_s1 = sld [smem:[#allocation2 + $0x19]]  ;;  %v248_v49 = vsel %vm244_vm4, %v232_v10, %v247_v30 }
  0x33   :  { %v515_v27 = vpop.eup %514  ;;  %v167_v43 = vadd.f32 %v166_v36, %v163_v28  ;;  %v181_v45 = vstv %s697_s14  ;;  %s737_s20 = sld [smem:[#allocation2 + $0x1b]]  ;;  %v253_v54 = vsel %vm243_vm3, %v250_v40, %v252_v41 }
  0x34   :  { %v79_v33 = vmul.f32 %v515_v27, %v78_v38  ;;  %v256_v38 = vsel %vm244_vm4, %v238_v13, %v255_v32  ;;  %522 = vtanh.f32 %v151_v35  ;;  %v182_v47 = vmul.f32 %v181_v45, %v621_v0  ;;  %s745_s21 = sld [smem:[#allocation2 + $0x1d]] }
  0x35   :  { %v184_v48 = vstv %s702_s17  ;;  %v257_v50 = vsel %vm243_vm3, %v254_v37, %v256_v38  ;;  %v170_v52 = vadd.f32 %v169_v39, %v167_v43  ;;  %s752_s22 = sld [smem:[#allocation2 + $0x1f]]  ;;  %v116_v0 = vstv %s691_s13 }
  0x36   :  { %v80_v42 = vadd.f32 %v79_v33, %v60_v21  ;;  %v185_v53 = vmul.f32 %v184_v48, %v623_v1  ;;  %v188_v55 = vstv %s708_s18  ;;  %s760_s23 = sld [smem:[#allocation2 + $0x21]]  ;;  %v249_v1 = vsel %vm243_vm3, %v246_v23, %v248_v49 }
  0x37   :  { %v517_v46 = vpop.eup %516  ;;  %v757_v56 = vmul.u32.u64.low %v660_v34, %v257_v50  ;;  %v758_v57 = vmul.u32.u64.high %v660_v34, %v257_v50, %v757_v56  ;;  %524 = vtanh.f32 %v170_v52  ;;  %s764_s24 = sld [smem:[#allocation2 + $0x23]]  ;;  %v135_v60 = vstv %s712_s0 }
  0x38   :  { %v98_v51 = vmul.f32 %v517_v46, %v97_v44  ;;  %v186_v44 = vadd.f32 %v185_v53, %v182_v47  ;;  %v768_v61 = vmul.u32.u64.low %v660_v34, %v253_v54  ;;  %v769_v62 = vmul.u32.u64.high %v660_v34, %v253_v54, %v768_v61  ;;  %s772_s25 = sld [smem:[#allocation2 + $0x24]] }
  0x39   :  { %v63_v63 = vstv %s734_s1  ;;  %v82_v7 = vstv %s737_s20  ;;  %v265_v31 = vmul.u32 %v660_v34, %v249_v1  ;;  %s779_s26 = sld [smem:[#allocation2 + $0x25]]  ;;  %v154_v34 = vstv %s722_s19 }
  0x3a   :  { %v99_v58 = vadd.f32 %v98_v51, %v80_v42  ;;  %v189_v4 = vadd.f32 %v188_v55, %v186_v44  ;;  %v64_v5 = vmul.f32 %v689_v14, %v63_v63  ;;  %vm267_vm5 = vc.u32 %v758_v57, %v768_v61  ;;  %s484_s27 = sld [smem:[#allocation2 + $0x26]] }
  0x3b   :  { %v519_v59 = vpop.eup %518  ;;  %v83_v8 = vmul.f32 %v515_v27, %v82_v7  ;;  %v101_v9 = vstv %s745_s21  ;;  %v120_v12 = vstv %s752_s22  ;;  %v268_v15 = vadd.s32 1, %v769_v62  ;;  %s485_s28 = sld [smem:[#allocation2 + $0x27]] }
  0x3c   :  { %v117_v3 = vmul.f32 %v519_v59, %v116_v0  ;;  %526 = vtanh.f32 %v189_v4  ;;  %v102_v11 = vmul.f32 %v517_v46, %v101_v9  ;;  %v121_v14 = vmul.f32 %v519_v59, %v120_v12  ;;  %s486_s29 = sld [smem:[#allocation2 + $0x28]] }
  0x3d   :  { %v84_v16 = vadd.f32 %v83_v8, %v64_v5  ;;  %v139_v17 = vstv %s760_s23  ;;  %v269_v19 = vsel %vm267_vm5, %v268_v15, %v769_v62  ;;  %v158_v22 = vstv %s764_s24  ;;  %s487_s30 = sld [smem:[#allocation2 + $0x29]] }
  0x3e   :  { %v118_v10 = vadd.f32 %v117_v3, %v99_v58  ;;  %v521_v13 = vpop.eup %520  ;;  %v270_v24 = vadd.s32 %v269_v19, %v265_v31  ;;  %v173_v30 = vstv %s772_s25  ;;  %v266_v56 = vadd.s32 %v768_v61, %v758_v57 }
  0x3f   :  { %v136_v18 = vmul.f32 %v521_v13, %v135_v60  ;;  %v103_v20 = vadd.f32 %v102_v11, %v84_v16  ;;  %v140_v21 = vmul.f32 %v521_v13, %v139_v17  ;;  %v177_v33 = vstv %s779_s26 }
  0x40   :  { %v271_v28 = vadd.s32 536870912, %v270_v24  ;;  %v192_v42 = vstv %s484_s27 }
  0x41   :  { %v137_v23 = vadd.f32 %v136_v18, %v118_v10  ;;  %v523_v25 = vpop.eup %522  ;;  %v122_v26 = vadd.f32 %v121_v14, %v103_v20  ;;  %v196_v43 = vstv %s485_s28  ;;  %v44_v14 = vld [vmem:[#allocation6 + $0x30] sm:$0xff] }
  0x42   :  { %v155_v27 = vmul.f32 %v523_v25, %v154_v34  ;;  %v159_v29 = vmul.f32 %v523_v25, %v158_v22  ;;  %v272_v36 = vshrl.u32 %v271_v28, 30  ;;  %v200_v18 = vstv %s486_s29 }
  0x43   :  { %v141_v32 = vadd.f32 %v140_v21, %v122_v26  ;;  %v314_v20 = vsub.f32 0.0, %v44_v14 }
  0x44   :  { %v156_v35 = vadd.f32 %v155_v27, %v137_v23  ;;  %v525_v37 = vpop.eup %524  ;;  %v273_v41 = vshll.u32 %v272_v36, 30  ;;  %v296_v8 = vsub.s32 4, %v272_v36  ;;  %v203_v23 = vstv %s487_s30 }
  0x45   :  { %v160_v39 = vadd.f32 %v159_v29, %v141_v32  ;;  %v174_v40 = vmul.f32 %v525_v37, %v173_v30  ;;  %v178_v38 = vmul.f32 %v525_v37, %v177_v33 }
  0x46   :  { %v274_v46 = vsub.s32 %v270_v24, %v273_v41  ;;  %v297_v9 = vsel %vm212_vm7, %v296_v8, %v272_v36 }
  0x47   :  { %v175_v45 = vadd.f32 %v174_v40, %v156_v35  ;;  %v179_v47 = vadd.f32 %v178_v38, %v160_v39  ;;  %v299_v11 = vsel %vm211_vm8, 0, %v297_v9 }
  0x48   :  { %v276_v50 = vsub.s32 0, %v274_v46  ;;  %v303_v12 = vadd.s32 3, %v299_v11  ;;  %v412_v15 = vand.u32 3, %v299_v11 }
  0x49   :  { %v527_v48 = vpop.eup %526 }
  0x4a   :  { %v193_v49 = vmul.f32 %v527_v48, %v192_v42  ;;  %v197_v51 = vmul.f32 %v527_v48, %v196_v43  ;;  %v489_v53 = vmin.u32 %v276_v50, %v274_v46  ;;  %v304_v13 = vand.u32 3, %v303_v12 }
  0x4b   :  { %vm417_vm10 = vcmp.eq.s32.totalorder %v412_v15, 2  ;;  %vm414_vm12 = vcmp.eq.s32.totalorder %v412_v15, 0  ;;  %vm413_vm14 = vcmp.lt.s32.totalorder %v412_v15, 2 }
  0x4c   :  { %v194_v52 = vadd.f32 %v193_v49, %v175_v45  ;;  %v198_v54 = vadd.f32 %v197_v51, %v179_v47  ;;  %v278_v0 = vclz %v489_v53  ;;  %vm309_vm9 = vcmp.eq.s32.totalorder %v304_v13, 2 }
  0x4d   :  { %vm306_vm11 = vcmp.eq.s32.totalorder %v304_v13, 0  ;;  %vm305_vm13 = vcmp.lt.s32.totalorder %v304_v13, 2 }
  0x4e   :  { %v490_v55 = vadd.s32 4294967294, %v278_v0  ;;  %v201_v25 = vadd.f32 %v200_v18, %v194_v52  ;;  %v204_v32 = vadd.f32 %v203_v23, %v198_v54 }
  0x50   :  { %vm491_vm6 = vcmp.lt.s32.totalorder %v490_v55, 0 }
  0x51   :  { %v281_v58 = vsel %vm491_vm6, 0, %v490_v55 }
  0x52   :  { %v282_v44 = vsub.s32 32, %v281_v58  ;;  %v283_v1 = vshll.u32 %v274_v46, %v281_v58  ;;  %v286_v59 = vsub.s32 4294967266, %v281_v58 }
  0x54   :  { %v284_v60 = vshrl.u32 %v266_v56, %v282_v44  ;;  %v287_v62 = vadd.s32 127, %v286_v59 }
  0x56   :  { %v285_v63 = vor.u32 %v284_v60, %v283_v1  ;;  %v288_v3 = vshll.u32 %v287_v62, 23 }
  0x58   :  { %v289_v4 = vor.u32 4788187, %v288_v3  ;;  %v292_v5 = vcvt.s32.f32 %v285_v63 }
  0x5a   :  { %v290_v7 = vand.u32 2147483647, %v289_v4 }
  0x5c   :  { %v293_v31 = vmul.f32 %v292_v5, %v290_v7 }
  0x5e   :  { %v294_v57 = vxor.u32 2147483648, %v293_v31 }
  0x60   :  { %v295_v61 = vsel %vm212_vm7, %v294_v57, %v293_v31 }
  0x61   :  { %v298_v10 = vsel %vm211_vm8, %v625_v2, %v295_v61 }
  0x62   :  { %528 = vcosq.f32 %v298_v10 }
  0x63   :  { %530 = vsinq.f32 %v298_v10 }
  0x6f   :  { %v529_v16 = vpop.eup %528 }
  0x70   :  { %v531_v17 = vpop.eup %530  ;;  %v310_v6 = vxor.u32 2147483648, %v529_v16 }
  0x71   :  { %v307_v34 = vxor.u32 2147483648, %v531_v17 }
  0x72   :  { %v311_v19 = vsel %vm309_vm9, %v310_v6, %v531_v17  ;;  %v419_v21 = vsel %vm417_vm10, %v310_v6, %v531_v17 }
  0x73   :  { %v308_v22 = vsel %vm306_vm11, %v529_v16, %v307_v34  ;;  %v416_v24 = vsel %vm414_vm12, %v529_v16, %v307_v34 }
  0x74   :  { %v312_v26 = vsel %vm305_vm13, %v308_v22, %v311_v19  ;;  %v420_v27 = vsel %vm413_vm14, %v416_v24, %v419_v21 }
  0x75   :  { %v313_v28 = vsel %vm302_vm15, nan, %v312_v26  ;;  %v421_v29 = vsel %vm302_vm15, nan, %v420_v27 }
  0x76   :  { %v315_v30 = vmul.f32 %v314_v20, %v313_v28  ;;  %v422_v33 = vmul.f32 %v421_v29, %v44_v14 }
  0x78   :  { %v316_v35 = vadd.f32 %v315_v30, %v201_v25  ;;  %v496_v36 = vadd.f32 -9.8, %v422_v33 }
  0x7a   :  { %318 = vst [vmem:[#allocation7 + $0x8] sm:$0xff] %v316_v35  ;;  %v424_v2 = vadd.f32 %v496_v36, %v204_v32 }
  0x7c   :  { %426 = vst [vmem:[#allocation7 + $0x18] sm:$0xff] %v424_v2 }
  0x7d   :  { %571 = shalt.err (!%p568_p9)
}
  0x7e   :  { %440 = dma.vmem_to_hbm [thread:$0]  %s435_s4, 768, %s805_s2, [#allocation4], %s588_s15, %s588_s15, %s589_s16  }
  0x7f   :  { %584 = dma.done.wait [#allocation4], 768  }
  0x80   :  { %585 = vsyncadd [#allocation4], 4294966528 }
  0x81   :  { %444 = vsyncpa [#allocation3], 1 }
  0x82   :  { %445 = vsyncpa [#allocation4], 1 }
  0x83   :  { %446 = vsyncpa [#allocation5], 1 }

</bundles_post_ra>
